<compile_context>
chip_gen: v6e
topology: v6e:2x2x1
jax: 0.10.0
libtpu: 0.0.40
codegen_flags: <defaults>
</compile_context>

<pallas_src>
import functools

import jax
import jax.numpy as jnp
from jax.experimental import pallas as pl
from jax.experimental.pallas import tpu as pltpu

F32 = jnp.float32
BF16 = jnp.bfloat16


def _vmem():
    return pl.BlockSpec(memory_space=pltpu.MemorySpace.VMEM)


def _row(v):
    return v.reshape(1, -1).astype(F32)


def _pick_tile(total, cap):
    """Largest divisor of `total` that is <= cap, preferring sublane-friendly multiples of 8."""
    divs = [t for t in range(1, min(total, cap) + 1) if total % t == 0]
    aligned = [t for t in divs if t % 8 == 0]
    return max(aligned) if aligned else max(divs)


# ------------------------- in-kernel helper functions ----------------------- #

def _mm(a, w):
    """MXU matmul: activation cast to bf16, weight already bf16, fp32 accumulation."""
    return jnp.dot(a.astype(BF16), w, preferred_element_type=F32)


def _ln(x, g, b, eps=1e-5):
    mu = jnp.mean(x, axis=-1, keepdims=True)
    var = jnp.mean((x - mu) ** 2, axis=-1, keepdims=True)
    return (x - mu) * jax.lax.rsqrt(var + eps) * g + b


def _bn_rows(x, g, b, relu, eps=1e-5):
    """training-mode BatchNorm1d: stats over the row axis (all rows are in VMEM)."""
    mu = jnp.mean(x, axis=0, keepdims=True)
    var = jnp.mean((x - mu) ** 2, axis=0, keepdims=True)
    y = (x - mu) * jax.lax.rsqrt(var + eps) * g + b
    return jnp.maximum(y, 0.0) if relu else y


# --------------------------- fused transformer block ------------------------ #

def _block_kernel(num_heads, apply_final_ln,
                  x_ref, pos_ref,
                  ln1g, ln1b, qkvw, qkvb, projw, projb,
                  ln2g, ln2b, fc1w, fc1b, fc2w, fc2b,
                  fng, fnb, o_ref):
    bt, N, C = x_ref.shape
    D = C // num_heads
    x = (x_ref[...] + pos_ref[...]).reshape(bt * N, C)         # fold `x + pos`

    # --- attention half (scale already folded into the Q slice of qkv_w/b) ---
    h = _ln(x, ln1g[...], ln1b[...])
    qkv = (_mm(h, qkvw[...]) + qkvb[...]).reshape(bt, N, 3 * C)
    heads = []
    for hd in range(num_heads):                                # lane-sliced heads in VMEM
        q = qkv[:, :, hd * D:(hd + 1) * D].astype(BF16)
        k = qkv[:, :, C + hd * D:C + (hd + 1) * D].astype(BF16)
        v = qkv[:, :, 2 * C + hd * D:2 * C + (hd + 1) * D].astype(BF16)
        s = jnp.einsum('bqd,bkd->bqk', q, k, preferred_element_type=F32)
        m = jnp.max(s, axis=-1, keepdims=True)
        p = jnp.exp(s - m)
        p = p * pl.reciprocal(jnp.sum(p, axis=-1, keepdims=True), approx=True)
        heads.append(jnp.einsum('bqk,bkd->bqd', p.astype(BF16), v,
                                preferred_element_type=F32))
    attn = jnp.concatenate(heads, axis=-1).reshape(bt * N, C)  # one K=C projection, no per-head matmuls
    x = x + _mm(attn, projw[...]) + projb[...]

    # --- MLP half ---
    h = _ln(x, ln2g[...], ln2b[...])
    # TODO(synk): approximate=True (tanh) moves GELU onto the EUP on v5e (slight numeric delta).
    h = jax.nn.gelu(_mm(h, fc1w[...]) + fc1b[...], approximate=False)
    y = x + _mm(h, fc2w[...]) + fc2b[...]
    if apply_final_ln:                                          # final encoder/decoder LN folded in
        y = _ln(y, fng[...], fnb[...])
    o_ref[...] = y.reshape(bt, N, C)


def transformer_block(x, pos, blk, num_heads, final_ln=None):
    """Pre-LN ViT block, one pallas_call gridded over batch tiles of size bt."""
    B, N, C = x.shape
    bt = _pick_tile(B, 8)
    if final_ln is None:
        apply_final = False
        fng, fnb = jnp.ones((1, C), F32), jnp.zeros((1, C), F32)   # dummies (unused)
    else:
        apply_final = True
        fng, fnb = final_ln

    params = [blk["ln1_g"], blk["ln1_b"], blk["qkv_w"], blk["qkv_b"],
              blk["proj_w"], blk["proj_b"], blk["ln2_g"], blk["ln2_b"],
              blk["fc1_w"], blk["fc1_b"], blk["fc2_w"], blk["fc2_b"], fng, fnb]
    tok_spec = pl.BlockSpec((bt, N, C), lambda b: (b, 0, 0))
    p_specs = [pl.BlockSpec(p.shape, lambda b: (0, 0)) for p in params]

    return pl.pallas_call(
        functools.partial(_block_kernel, num_heads, apply_final),
        out_shape=jax.ShapeDtypeStruct((B, N, C), F32),
        grid=(B // bt,),
        in_specs=[tok_spec, tok_spec] + p_specs,
        out_specs=pl.BlockSpec((bt, N, C), lambda b: (b, 0, 0)),
        compiler_params=pltpu.CompilerParams(
            dimension_semantics=("parallel",),
            vmem_limit_bytes=64 * 1024 * 1024),
    )(x, pos, *params)


# ----------------- mini-PointNet group encoder (3 gridded passes) ----------- #

def _pe1_kernel(x_ref, w1, b1, a1_ref, s_ref, ss_ref):
    """conv1 (3->128) per group tile + running BN1 statistics (sum / sumsq)."""
    @pl.when(pl.program_id(0) == 0)
    def _():
        s_ref[...] = jnp.zeros_like(s_ref)
        ss_ref[...] = jnp.zeros_like(ss_ref)
    gt, S, _ = x_ref.shape
    a = _mm(x_ref[...].reshape(gt * S, 3), w1[...]) + b1[...]       # (gt*S, 128)
    a1_ref[...] = a.reshape(gt, S, 128)
    s_ref[...] += jnp.sum(a, axis=0, keepdims=True)
    ss_ref[...] += jnp.sum(a * a, axis=0, keepdims=True)


def _pe2_kernel(inv_count, a1_ref, s1, ss1, g1, bb1, w2, b2, w3g, w3h, b3,
                a2_ref, s2_ref, ss2_ref):
    """BN1+ReLU+conv2, per-group maxpool, split conv3 (global/local) + BN2 statistics."""
    @pl.when(pl.program_id(0) == 0)
    def _():
        s2_ref[...] = jnp.zeros_like(s2_ref)
        ss2_ref[...] = jnp.zeros_like(ss2_ref)
    gt, S, F1 = a1_ref.shape
    mu = s1[...] * inv_count
    var = ss1[...] * inv_count - mu * mu
    h = (a1_ref[...].reshape(gt * S, F1) - mu) * jax.lax.rsqrt(var + 1e-5) * g1[...] + bb1[...]
    h = jnp.maximum(h, 0.0)
    h = _mm(h, w2[...]) + b2[...]                                  # (gt*S, 256)
    h3 = h.reshape(gt, S, 256)
    gmax = jnp.max(h3, axis=1)                                     # (gt, 256) per-group global feat
    # feat@w3 == concat([global, local])@w3 == global@w3[:256] + local@w3[256:]
    a2 = _mm(h, w3h[...]).reshape(gt, S, 512) + (_mm(gmax, w3g[...]) + b3[...])[:, None, :]
    a2_ref[...] = a2
    a2f = a2.reshape(gt * S, 512)
    s2_ref[...] += jnp.sum(a2f, axis=0, keepdims=True)
    ss2_ref[...] += jnp.sum(a2f * a2f, axis=0, keepdims=True)


def _pe3_kernel(inv_count, a2_ref, s2, ss2, g2, bb2, w4, b4, tok_ref):
    """BN2+ReLU+conv4 (512->C) + per-group maxpool -> group tokens."""
    gt, S, F2 = a2_ref.shape
    mu = s2[...] * inv_count
    var = ss2[...] * inv_count - mu * mu
    h = (a2_ref[...].reshape(gt * S, F2) - mu) * jax.lax.rsqrt(var + 1e-5) * g2[...] + bb2[...]
    h = jnp.maximum(h, 0.0)
    h = _mm(h, w4[...]) + b4[...]                                  # (gt*S, C)
    C = h.shape[-1]
    tok_ref[...] = jnp.max(h.reshape(gt, S, C), axis=1)


def point_encoder(p, neighborhood):
    """Point-MAE Encoder: three gridded Pallas passes (train-mode BN stats span all groups)."""
    B, G, S, _ = neighborhood.shape
    BG = B * G
    C = p["w4"].shape[1]
    gtile = _pick_tile(BG, 32)
    ngrid = BG // gtile
    inv_count = 1.0 / float(BG * S)
    x = neighborhood.reshape(BG, S, 3)

    def wspec(w):
        return pl.BlockSpec(w.shape, lambda g: (0, 0))

    a1, s1, ss1 = pl.pallas_call(
        _pe1_kernel,
        out_shape=(jax.ShapeDtypeStruct((BG, S, 128), F32),
                   jax.ShapeDtypeStruct((1, 128), F32),
                   jax.ShapeDtypeStruct((1, 128), F32)),
        grid=(ngrid,),
        in_specs=[pl.BlockSpec((gtile, S, 3), lambda g: (g, 0, 0)),
                  wspec(p["w1"]), wspec(p["b1"])],
        out_specs=(pl.BlockSpec((gtile, S, 128), lambda g: (g, 0, 0)),
                   pl.BlockSpec((1, 128), lambda g: (0, 0)),
                   pl.BlockSpec((1, 128), lambda g: (0, 0))),
        compiler_params=pltpu.CompilerParams(dimension_semantics=("arbitrary",)),
    )(x, p["w1"], p["b1"])

    a2, s2, ss2 = pl.pallas_call(
        functools.partial(_pe2_kernel, inv_count),
        out_shape=(jax.ShapeDtypeStruct((BG, S, 512), F32),
                   jax.ShapeDtypeStruct((1, 512), F32),
                   jax.ShapeDtypeStruct((1, 512), F32)),
        grid=(ngrid,),
        in_specs=[pl.BlockSpec((gtile, S, 128), lambda g: (g, 0, 0)),
                  wspec(s1), wspec(ss1),
                  wspec(p["bn1_g"]), wspec(p["bn1_b"]),
                  wspec(p["w2"]), wspec(p["b2"]),
                  wspec(p["w3g"]), wspec(p["w3h"]), wspec(p["b3"])],
        out_specs=(pl.BlockSpec((gtile, S, 512), lambda g: (g, 0, 0)),
                   pl.BlockSpec((1, 512), lambda g: (0, 0)),
                   pl.BlockSpec((1, 512), lambda g: (0, 0))),
        compiler_params=pltpu.CompilerParams(dimension_semantics=("arbitrary",)),
    )(a1, s1, ss1, p["bn1_g"], p["bn1_b"], p["w2"], p["b2"], p["w3g"], p["w3h"], p["b3"])

    tokens = pl.pallas_call(
        functools.partial(_pe3_kernel, inv_count),
        out_shape=jax.ShapeDtypeStruct((BG, C), F32),
        grid=(ngrid,),
        in_specs=[pl.BlockSpec((gtile, S, 512), lambda g: (g, 0, 0)),
                  wspec(s2), wspec(ss2),
                  wspec(p["bn2_g"]), wspec(p["bn2_b"]),
                  wspec(p["w4"]), wspec(p["b4"])],
        out_specs=pl.BlockSpec((gtile, C), lambda g: (g, 0)),
        compiler_params=pltpu.CompilerParams(dimension_semantics=("parallel",)),
    )(a2, s2, ss2, p["bn2_g"], p["bn2_b"], p["w4"], p["b4"])
    return tokens.reshape(B, G, C)


# ------------------------------- pos-embed MLP ------------------------------ #

def _posmlp_kernel(x_ref, w1, b1, w2, b2, o_ref):
    h = jax.nn.gelu(_mm(x_ref[...], w1[...]) + b1[...], approximate=False)
    o_ref[...] = _mm(h, w2[...]) + b2[...]


def pos_mlp(p, centers):
    """nn.Sequential(Linear(3,128), GELU, Linear(128,C)) over flattened (B*n, 3) rows."""
    B, n, _ = centers.shape
    C = p["w2"].shape[1]
    out = pl.pallas_call(
        _posmlp_kernel,
        out_shape=jax.ShapeDtypeStruct((B * n, C), F32),
        in_specs=[_vmem()] * 5,
        out_specs=_vmem(),
    )(centers.reshape(B * n, 3), p["w1"], p["b1"], p["w2"], p["b2"])
    return out.reshape(B, n, C)


# ---------------------- increase_dim + Chamfer-L2 reconstruction ------------ #

def _linear_kernel(x_ref, w_ref, b_ref, o_ref):
    o_ref[...] = _mm(x_ref[...], w_ref[...]) + b_ref[...]


def linear(x, w, b):
    """y = x @ w + b (1x1 Conv1d as matmul). TODO(synk): pad 3*S output to 128 lanes for real S."""
    M, N = x.shape[0], w.shape[1]
    return pl.pallas_call(
        _linear_kernel,
        out_shape=jax.ShapeDtypeStruct((M, N), F32),
        in_specs=[_vmem()] * 3,
        out_specs=_vmem(),
    )(x, w, b)


def _chamfer_l2_kernel(x_ref, y_ref, o_ref):
    x = x_ref[...]                                  # (gt, S, 3)
    y = y_ref[...]
    diff = x[:, :, None, :] - y[:, None, :, :]      # VPU distances (no K=3 MXU einsum)
    d = jnp.sum(diff * diff, axis=-1)               # (gt, S, S)
    d1 = jnp.mean(jnp.min(d, axis=2), axis=1, keepdims=True)   # x -> nearest y
    d2 = jnp.mean(jnp.min(d, axis=1), axis=1, keepdims=True)   # y -> nearest x
    o_ref[...] = d1 + d2


def chamfer_l2(x, y):
    """Chamfer-L2 gridded over groups (parallel) -> per-group loss, mean taken outside."""
    Nb, S, _ = x.shape
    gt = _pick_tile(Nb, 16)
    per_group = pl.pallas_call(
        _chamfer_l2_kernel,
        out_shape=jax.ShapeDtypeStruct((Nb, 1), F32),
        grid=(Nb // gt,),
        in_specs=[pl.BlockSpec((gt, S, 3), lambda g: (g, 0, 0)),
                  pl.BlockSpec((gt, S, 3), lambda g: (g, 0, 0))],
        out_specs=pl.BlockSpec((gt, 1), lambda g: (g, 0)),
        compiler_params=pltpu.CompilerParams(dimension_semantics=("parallel",)),
    )(x, y)
    return jnp.mean(per_group)


# --------------------------- fused tail-loss kernel ------------------------- #

def _tail_loss_kernel(inv_t,
                      cls_ref, imgt_ref, txtt_ref, imgf_ref, capf_ref, sel_ref,
                      imgw, imgb, txtw, txtb,
                      w1, b1, g1, bb1, w2, b2, g2, bb2,
                      o_img, o_txt, o_smc):
    def smooth_l1(a, b_):
        d = a - b_
        ad = jnp.abs(d)
        return jnp.mean(jnp.where(ad < 1.0, 0.5 * d * d, ad - 0.5))

    # csc_img: SmoothL1(img_scene_feat, img_proj(img_token))
    img_pred = _mm(imgt_ref[...], imgw[...]) + imgb[...]
    o_img[0, 0] = smooth_l1(imgf_ref[...], img_pred)

    # csc_text: SmoothL1(caption_feat, text_proj(text_token))
    txt_pred = _mm(txtt_ref[...], txtw[...]) + txtb[...]
    o_txt[0, 0] = smooth_l1(capf_ref[...], txt_pred)

    # smc: cls_proj (Linear-BN-ReLU-Linear-BN) -> normalize -> cosine sim -> ContrastiveHead
    h = _mm(cls_ref[...], w1[...]) + b1[...]
    h = _bn_rows(h, g1[...], bb1[...], relu=True)
    h = _mm(h, w2[...]) + b2[...]
    h = _bn_rows(h, g2[...], bb2[...], relu=False)
    n = h * jax.lax.rsqrt(jnp.sum(h * h, axis=-1, keepdims=True) + 1e-12)
    sim = jax.lax.dot_general(n, n, (((1,), (1,)), ((), ())),
                              preferred_element_type=F32) * inv_t
    sel = sel_ref[...]
    pos = jnp.sum(sim * sel, axis=1, keepdims=True) / jnp.maximum(
        jnp.sum(sel, axis=1, keepdims=True), 1.0)
    neg = jnp.where(sel == 0.0, sim, -1e30)         # finite sentinel (robust vs -inf arithmetic)
    m = jnp.maximum(pos, jnp.max(neg, axis=1, keepdims=True))
    lse = m + jnp.log(jnp.exp(pos - m) + jnp.sum(jnp.exp(neg - m), axis=1, keepdims=True))
    o_smc[0, 0] = jnp.mean(lse - pos)


def tail_losses(prep, cls_token, img_token, text_token,
                img_scene_feat, caption_feat, text_labels, temperature=0.1):
    # TODO(synk): grid over batch tiles for very large batches (one TC handles B=2 trivially).
    select = (text_labels[:, None] == text_labels[None, :]).astype(F32)
    cp = prep["cls_proj"]
    inputs = [cls_token, img_token, text_token, img_scene_feat, caption_feat, select,
              prep["img_proj_w"], prep["img_proj_b"],
              prep["text_proj_w"], prep["text_proj_b"],
              cp["w1"], cp["b1"], cp["bn1_g"], cp["bn1_b"],
              cp["w2"], cp["b2"], cp["bn2_g"], cp["bn2_b"]]
    o_img, o_txt, o_smc = pl.pallas_call(
        functools.partial(_tail_loss_kernel, 1.0 / temperature),
        out_shape=tuple(jax.ShapeDtypeStruct((1, 1), F32) for _ in range(3)),
        in_specs=[_vmem()] * len(inputs),
        out_specs=tuple(_vmem() for _ in range(3)),
    )(*inputs)
    return o_img[0, 0], o_txt[0, 0], o_smc[0, 0]


# --------------------------------- masking ---------------------------------- #

def rand_mask(key, B, G, num_mask):
    """MaskTransformer._mask_center_rand (deterministic via JAX PRNG, vmapped over batch)."""
    keys = jax.random.split(key, B)
    perms = jax.vmap(lambda k: jax.random.permutation(k, G))(keys)
    base = jnp.zeros((B, G), jnp.bool_)
    return jax.vmap(lambda m, p: m.at[p[:num_mask]].set(True))(base, perms)


# ------------------------------- parameters --------------------------------- #

def init_params(key, cfg):
    C = cfg["trans_dim"]
    S = cfg["group_size"]
    hidden = int(cfg["mlp_ratio"] * C)
    keys = iter(jax.random.split(key, 256))

    def tn(shape, std=0.02):              # trunc_normal_(std=0.02)
        return std * jax.random.truncated_normal(next(keys), -2.0, 2.0, shape, F32)

    def nrm(shape, mean=0.02, std=0.01):  # ReCon._init_weights for proj heads
        return mean + std * jax.random.normal(next(keys), shape, F32)

    zeros = lambda s: jnp.zeros(s, F32)
    ones = lambda s: jnp.ones(s, F32)

    def block_params():
        return dict(
            ln1_g=ones((C,)), ln1_b=zeros((C,)),
            qkv_w=tn((C, 3 * C)), qkv_b=zeros((3 * C,)),
            proj_w=tn((C, C)), proj_b=zeros((C,)),
            ln2_g=ones((C,)), ln2_b=zeros((C,)),
            fc1_w=tn((C, hidden)), fc1_b=zeros((hidden,)),
            fc2_w=tn((hidden, C)), fc2_b=zeros((C,)),
        )

    return dict(
        encoder=dict(
            w1=tn((3, 128)), b1=zeros((128,)), bn1_g=ones((128,)), bn1_b=zeros((128,)),
            w2=tn((128, 256)), b2=zeros((256,)),
            w3=tn((512, 512)), b3=zeros((512,)), bn2_g=ones((512,)), bn2_b=zeros((512,)),
            w4=tn((512, C)), b4=zeros((C,)),
        ),
        pos_embed=dict(w1=tn((3, 128)), b1=zeros((128,)), w2=tn((128, C)), b2=zeros((C,))),
        dec_pos_embed=dict(w1=tn((3, 128)), b1=zeros((128,)), w2=tn((128, C)), b2=zeros((C,))),
        cls_token=tn((C,)), cls_pos=tn((C,)),
        img_token=tn((C,)), img_pos=tn((C,)),
        text_token=tn((C,)), text_pos=tn((C,)),
        mask_token=tn((C,)),
        enc_blocks=[block_params() for _ in range(cfg["depth"])],
        enc_norm_g=ones((C,)), enc_norm_b=zeros((C,)),
        dec_blocks=[block_params() for _ in range(cfg["decoder_depth"])],
        dec_norm_g=ones((C,)), dec_norm_b=zeros((C,)),
        inc_w=tn((C, 3 * S)), inc_b=zeros((3 * S,)),          # increase_dim Conv1d
        img_proj_w=nrm((C, 1024)), img_proj_b=zeros((1024,)),
        text_proj_w=nrm((C, 512)), text_proj_b=zeros((512,)),
        cls_proj=dict(
            w1=nrm((C, 128)), b1=zeros((128,)), bn1_g=ones((128,)), bn1_b=zeros((128,)),
            w2=nrm((128, 128)), b2=zeros((128,)), bn2_g=ones((128,)), bn2_b=zeros((128,)),
        ),
    )


def prepare_params(params, cfg):
    """Host-side one-time prep: bf16 matmul weights, row-shaped biases/LN/BN params,
    attention scale folded into the Q slice of qkv, encoder w3 split into global/local halves."""
    C = cfg["trans_dim"]
    bf = lambda w: w.astype(BF16)

    def prep_block(blk, num_heads):
        scale = float((C // num_heads) ** -0.5)
        qkv_w = blk["qkv_w"].at[:, :C].multiply(scale)          # fold softmax scale into Q
        qkv_b = blk["qkv_b"].at[:C].multiply(scale)
        return dict(
            ln1_g=_row(blk["ln1_g"]), ln1_b=_row(blk["ln1_b"]),
            qkv_w=bf(qkv_w), qkv_b=_row(qkv_b),
            proj_w=bf(blk["proj_w"]), proj_b=_row(blk["proj_b"]),
            ln2_g=_row(blk["ln2_g"]), ln2_b=_row(blk["ln2_b"]),
            fc1_w=bf(blk["fc1_w"]), fc1_b=_row(blk["fc1_b"]),
            fc2_w=bf(blk["fc2_w"]), fc2_b=_row(blk["fc2_b"]),
        )

    enc = params["encoder"]
    cp = params["cls_proj"]
    return dict(
        encoder=dict(
            w1=bf(enc["w1"]), b1=_row(enc["b1"]),
            bn1_g=_row(enc["bn1_g"]), bn1_b=_row(enc["bn1_b"]),
            w2=bf(enc["w2"]), b2=_row(enc["b2"]),
            w3g=bf(enc["w3"][:256]), w3h=bf(enc["w3"][256:]), b3=_row(enc["b3"]),
            bn2_g=_row(enc["bn2_g"]), bn2_b=_row(enc["bn2_b"]),
            w4=bf(enc["w4"]), b4=_row(enc["b4"]),
        ),
        pos_embed=dict(w1=bf(params["pos_embed"]["w1"]), b1=_row(params["pos_embed"]["b1"]),
                       w2=bf(params["pos_embed"]["w2"]), b2=_row(params["pos_embed"]["b2"])),
        dec_pos_embed=dict(w1=bf(params["dec_pos_embed"]["w1"]), b1=_row(params["dec_pos_embed"]["b1"]),
                           w2=bf(params["dec_pos_embed"]["w2"]), b2=_row(params["dec_pos_embed"]["b2"])),
        cls_token=params["cls_token"], cls_pos=params["cls_pos"],
        img_token=params["img_token"], img_pos=params["img_pos"],
        text_token=params["text_token"], text_pos=params["text_pos"],
        mask_token=params["mask_token"],
        enc_blocks=[prep_block(b, cfg["num_heads"]) for b in params["enc_blocks"]],
        enc_norm_g=_row(params["enc_norm_g"]), enc_norm_b=_row(params["enc_norm_b"]),
        dec_blocks=[prep_block(b, cfg["decoder_num_heads"]) for b in params["dec_blocks"]],
        dec_norm_g=_row(params["dec_norm_g"]), dec_norm_b=_row(params["dec_norm_b"]),
        inc_w=bf(params["inc_w"]), inc_b=_row(params["inc_b"]),
        img_proj_w=bf(params["img_proj_w"]), img_proj_b=_row(params["img_proj_b"]),
        text_proj_w=bf(params["text_proj_w"]), text_proj_b=_row(params["text_proj_b"]),
        cls_proj=dict(
            w1=bf(cp["w1"]), b1=_row(cp["b1"]), bn1_g=_row(cp["bn1_g"]), bn1_b=_row(cp["bn1_b"]),
            w2=bf(cp["w2"]), b2=_row(cp["b2"]), bn2_g=_row(cp["bn2_g"]), bn2_b=_row(cp["bn2_b"]),
        ),
    )


# --------------------------------- forward ----------------------------------- #

def recon_forward(prep, cfg, pts, neighborhood, center,
                  img_scene_feat, caption_feat, text_labels, mask_key):
    del pts  # only used by the (external) group divider / image pairing
    B, G, S, _ = neighborhood.shape
    C = cfg["trans_dim"]
    num_mask = int(cfg["mask_ratio"] * G)
    num_vis = G - num_mask

    # --- masking (rand) ---
    mask = rand_mask(mask_key, B, G, num_mask)                   # bool [B,G]
    order = jnp.argsort(mask.astype(jnp.int32), axis=1, stable=True)
    vis_idx, msk_idx = order[:, :num_vis], order[:, num_vis:]

    # --- MAE encoder ---
    tokens = point_encoder(prep["encoder"], neighborhood)        # [B,G,C]   (3 gridded calls)
    x_vis = jnp.take_along_axis(tokens, vis_idx[:, :, None], axis=1)
    vis_center = jnp.take_along_axis(center, vis_idx[:, :, None], axis=1)
    ord_center = jnp.take_along_axis(center, order[:, :, None], axis=1)     # [vis | mask]

    pos_vis = pos_mlp(prep["pos_embed"], vis_center)             # [B,nv,C]

    def tok(t):
        return jnp.broadcast_to(t.reshape(1, 1, C), (B, 1, C))

    x = jnp.concatenate([tok(prep["cls_token"]), tok(prep["img_token"]),
                         tok(prep["text_token"]), x_vis], axis=1)
    pos = jnp.concatenate([tok(prep["cls_pos"]), tok(prep["img_pos"]),
                           tok(prep["text_pos"]), pos_vis], axis=1)

    n_enc = len(prep["enc_blocks"])
    for i, blk in enumerate(prep["enc_blocks"]):                 # x = block(x + pos); final LN folded
        fin = (prep["enc_norm_g"], prep["enc_norm_b"]) if i == n_enc - 1 else None
        x = transformer_block(x, pos, blk, cfg["num_heads"], final_ln=fin)
    cls_token, img_token, text_token, x_vis_out = x[:, 0], x[:, 1], x[:, 2], x[:, 3:]

    # --- MAE decoder ---
    pos_full = pos_mlp(prep["dec_pos_embed"], ord_center)        # [B,G,C] = [pos_vis | pos_mask]
    mask_tok = jnp.broadcast_to(prep["mask_token"].reshape(1, 1, C), (B, num_mask, C))
    xd = jnp.concatenate([x_vis_out, mask_tok], axis=1)
    n_dec = len(prep["dec_blocks"])
    for i, blk in enumerate(prep["dec_blocks"]):
        fin = (prep["dec_norm_g"], prep["dec_norm_b"]) if i == n_dec - 1 else None
        xd = transformer_block(xd, pos_full, blk, cfg["decoder_num_heads"], final_ln=fin)
    x_rec = xd[:, -num_mask:]                                    # masked tokens

    losses = {}

    # --- mdm: rebuild masked point groups, Chamfer-L2 vs ground truth ---
    M = num_mask
    rebuild = linear(x_rec.reshape(B * M, C), prep["inc_w"], prep["inc_b"])
    rebuild = rebuild.reshape(B * M, S, 3)
    gt = jnp.take_along_axis(neighborhood, msk_idx[:, :, None, None], axis=1).reshape(B * M, S, 3)
    losses["mdm"] = chamfer_l2(rebuild, gt)

    # --- csc_img / csc_text / smc fused into one launch ---
    csc_img, csc_text, smc = tail_losses(prep, cls_token, img_token, text_token,
                                         img_scene_feat, caption_feat, text_labels)
    losses["csc_img"] = csc_img
    losses["csc_text"] = csc_text
    losses["smc"] = smc

    total = losses["mdm"] + losses["csc_img"] + losses["csc_text"] + losses["smc"]
    return total, losses


# ----------------------------------- main ------------------------------------ #

if __name__ == "__main__":
    cfg = dict(trans_dim=32, depth=2, num_heads=4,
               decoder_depth=2, decoder_num_heads=4,
               group_size=8, num_group=8, mask_ratio=0.6, mlp_ratio=4)

    key = jax.random.PRNGKey(0)
    k_param, k_pts, k_nb, k_c, k_img, k_cap, k_mask = jax.random.split(key, 7)
    params = init_params(k_param, cfg)
    prep = prepare_params(params, cfg)     # one-time: bf16 weights, folded scale, split w3

    B, pts_N = 2, 64
    G, S = cfg["num_group"], cfg["group_size"]
    pts = jax.random.normal(k_pts, (B, pts_N, 3), jnp.float32)
    center = jax.random.normal(k_c, (B, G, 3), jnp.float32)
    neighborhood = 0.1 * jax.random.normal(k_nb, (B, G, S, 3), jnp.float32)
    img_scene_feat = jax.random.normal(k_img, (B, 1024), jnp.float32)   # frozen image encoder output
    caption_feat = jax.random.normal(k_cap, (B, 512), jnp.float32)      # frozen text encoder output
    text_labels = jnp.array([0, 1], dtype=jnp.int32)                    # synthetic caption labels

    total, losses = recon_forward(prep, cfg, pts, neighborhood, center,
                                  img_scene_feat, caption_feat, text_labels, k_mask)
    total = jax.block_until_ready(total)
    assert bool(jnp.isfinite(total)), "loss is not finite"
    print("KERNEL_OK")
</pallas_src>

<mosaic_0001>
module attributes {stable_mosaic.version = 11 : i64} {
  func.func @_pe1_kernel(%arg0: i32, %arg1: memref<16x8x3xf32, #tpu.memory_space<vmem>>, %arg2: memref<3x128xbf16, #tpu.memory_space<vmem>>, %arg3: memref<1x128xf32, #tpu.memory_space<vmem>>, %arg4: memref<16x8x128xf32, #tpu.memory_space<vmem>>, %arg5: memref<1x128xf32, #tpu.memory_space<vmem>>, %arg6: memref<1x128xf32, #tpu.memory_space<vmem>>) attributes {dimension_semantics = [#tpu.dimension_semantics<arbitrary>], iteration_bounds = array<i64: 1>, scalar_prefetch = 0 : i64, scratch_operands = 0 : i64, tpu.core_type = #tpu.core_type<tc>, window_params = [{transform_indices = @transform_0, window_bounds = array<i64: 16, 8, 3>}, {pipeline_mode = #tpu.pipeline_mode<synchronous>, transform_indices = @transform_1, window_bounds = array<i64: 3, 128>}, {pipeline_mode = #tpu.pipeline_mode<synchronous>, transform_indices = @transform_2, window_bounds = array<i64: 1, 128>}, {transform_indices = @transform_3, window_bounds = array<i64: 16, 8, 128>}, {pipeline_mode = #tpu.pipeline_mode<synchronous>, transform_indices = @transform_4, window_bounds = array<i64: 1, 128>}, {pipeline_mode = #tpu.pipeline_mode<synchronous>, transform_indices = @transform_5, window_bounds = array<i64: 1, 128>}]} {
    %c0_i32 = arith.constant 0 : i32
    %0 = arith.cmpi eq, %arg0, %c0_i32 : i32
    %1 = arith.extui %0 : i1 to i32
    %c0_i32_0 = arith.constant 0 : i32
    %2 = arith.cmpi ne, %1, %c0_i32_0 : i32
    scf.if %2 {
      %cst_20 = arith.constant 0.000000e+00 : f32
      %24 = vector.broadcast %cst_20 : f32 to vector<1x128xf32>
      %c0_21 = arith.constant 0 : index
      %c0_22 = arith.constant 0 : index
      %25 = vector.load %arg5[%c0_21, %c0_22] : memref<1x128xf32, #tpu.memory_space<vmem>>, vector<1x128xf32>
      tpu.vector_store %arg5[%c0_21, %c0_22], %24 {strides = array<i32>} : memref<1x128xf32, #tpu.memory_space<vmem>>, vector<1x128xf32>,
      %cst_23 = arith.constant 0.000000e+00 : f32
      %26 = vector.broadcast %cst_23 : f32 to vector<1x128xf32>
      %c0_24 = arith.constant 0 : index
      %c0_25 = arith.constant 0 : index
      %27 = vector.load %arg6[%c0_24, %c0_25] : memref<1x128xf32, #tpu.memory_space<vmem>>, vector<1x128xf32>
      tpu.vector_store %arg6[%c0_24, %c0_25], %26 {strides = array<i32>} : memref<1x128xf32, #tpu.memory_space<vmem>>, vector<1x128xf32>,
    } else {
    }
    %c0 = arith.constant 0 : index
    %c0_1 = arith.constant 0 : index
    %c0_2 = arith.constant 0 : index
    %3 = vector.load %arg1[%c0, %c0_1, %c0_2] : memref<16x8x3xf32, #tpu.memory_space<vmem>>, vector<16x8x3xf32>
    %4 = vector.shape_cast %3 : vector<16x8x3xf32> to vector<128x3xf32>
    %c0_3 = arith.constant 0 : index
    %c0_4 = arith.constant 0 : index
    %5 = vector.load %arg2[%c0_3, %c0_4] : memref<3x128xbf16, #tpu.memory_space<vmem>>, vector<3x128xbf16>
    %6 = arith.truncf %4 : vector<128x3xf32> to vector<128x3xbf16>
    %cst = arith.constant dense<0.000000e+00> : vector<128x128xf32>
    %7 = tpu.matmul %6, %5, %cst {dimension_numbers = #tpu.dot_dimension_numbers<[1], [0], [0], [1], [0, 0, 1, 1], [], []>} : vector<128x3xbf16>, vector<3x128xbf16>, vector<128x128xf32> -> vector<128x128xf32>
    %c0_5 = arith.constant 0 : index
    %c0_6 = arith.constant 0 : index
    %8 = vector.load %arg3[%c0_5, %c0_6] : memref<1x128xf32, #tpu.memory_space<vmem>>, vector<1x128xf32>
    %9 = vector.broadcast %8 : vector<1x128xf32> to vector<128x128xf32>
    %10 = arith.addf %7, %9 : vector<128x128xf32>
    %11 = vector.shape_cast %10 : vector<128x128xf32> to vector<16x8x128xf32>
    %c0_7 = arith.constant 0 : index
    %c0_8 = arith.constant 0 : index
    %c0_9 = arith.constant 0 : index
    %12 = vector.load %arg4[%c0_7, %c0_8, %c0_9] : memref<16x8x128xf32, #tpu.memory_space<vmem>>, vector<16x8x128xf32>
    tpu.vector_store %arg4[%c0_7, %c0_8, %c0_9], %11 {strides = array<i32>} : memref<16x8x128xf32, #tpu.memory_space<vmem>>, vector<16x8x128xf32>,
    %c0_10 = arith.constant 0 : index
    %c0_11 = arith.constant 0 : index
    %13 = vector.load %arg5[%c0_10, %c0_11] : memref<1x128xf32, #tpu.memory_space<vmem>>, vector<1x128xf32>
    %cst_12 = arith.constant dense<0.000000e+00> : vector<128xf32>
    %14 = vector.multi_reduction <add>, %10, %cst_12 [0] : vector<128x128xf32> to vector<128xf32>
    %15 = vector.shape_cast %14 : vector<128xf32> to vector<1x128xf32>
    %16 = arith.addf %13, %15 : vector<1x128xf32>
    %c0_13 = arith.constant 0 : index
    %c0_14 = arith.constant 0 : index
    %17 = vector.load %arg5[%c0_13, %c0_14] : memref<1x128xf32, #tpu.memory_space<vmem>>, vector<1x128xf32>
    tpu.vector_store %arg5[%c0_13, %c0_14], %16 {strides = array<i32>} : memref<1x128xf32, #tpu.memory_space<vmem>>, vector<1x128xf32>,
    %c0_15 = arith.constant 0 : index
    %c0_16 = arith.constant 0 : index
    %18 = vector.load %arg6[%c0_15, %c0_16] : memref<1x128xf32, #tpu.memory_space<vmem>>, vector<1x128xf32>
    %19 = arith.mulf %10, %10 : vector<128x128xf32>
    %cst_17 = arith.constant dense<0.000000e+00> : vector<128xf32>
    %20 = vector.multi_reduction <add>, %19, %cst_17 [0] : vector<128x128xf32> to vector<128xf32>
    %21 = vector.shape_cast %20 : vector<128xf32> to vector<1x128xf32>
    %22 = arith.addf %18, %21 : vector<1x128xf32>
    %c0_18 = arith.constant 0 : index
    %c0_19 = arith.constant 0 : index
    %23 = vector.load %arg6[%c0_18, %c0_19] : memref<1x128xf32, #tpu.memory_space<vmem>>, vector<1x128xf32>
    tpu.vector_store %arg6[%c0_18, %c0_19], %22 {strides = array<i32>} : memref<1x128xf32, #tpu.memory_space<vmem>>, vector<1x128xf32>,
    return
  }
  func.func @transform_0(%arg0: i32) -> (i32, i32, i32) {
    %c0_i32 = arith.constant 0 : i32
    %c0_i32_0 = arith.constant 0 : i32
    %c0_i32_1 = arith.constant 0 : i32
    return %arg0, %c0_i32, %c0_i32_0 : i32, i32, i32
  }
  func.func @transform_1(%arg0: i32) -> (i32, i32) {
    %c0_i32 = arith.constant 0 : i32
    %c0_i32_0 = arith.constant 0 : i32
    %c0_i32_1 = arith.constant 0 : i32
    return %c0_i32, %c0_i32_0 : i32, i32
  }
  func.func @transform_2(%arg0: i32) -> (i32, i32) {
    %c0_i32 = arith.constant 0 : i32
    %c0_i32_0 = arith.constant 0 : i32
    %c0_i32_1 = arith.constant 0 : i32
    return %c0_i32, %c0_i32_0 : i32, i32
  }
  func.func @transform_3(%arg0: i32) -> (i32, i32, i32) {
    %c0_i32 = arith.constant 0 : i32
    %c0_i32_0 = arith.constant 0 : i32
    %c0_i32_1 = arith.constant 0 : i32
    return %arg0, %c0_i32, %c0_i32_0 : i32, i32, i32
  }
  func.func @transform_4(%arg0: i32) -> (i32, i32) {
    %c0_i32 = arith.constant 0 : i32
    %c0_i32_0 = arith.constant 0 : i32
    %c0_i32_1 = arith.constant 0 : i32
    return %c0_i32, %c0_i32_0 : i32, i32
  }
  func.func @transform_5(%arg0: i32) -> (i32, i32) {
    %c0_i32 = arith.constant 0 : i32
    %c0_i32_0 = arith.constant 0 : i32
    %c0_i32_1 = arith.constant 0 : i32
    return %c0_i32, %c0_i32_0 : i32, i32
  }
}

</mosaic_0001>

<bundles_post_ra>
// kernel: tpu_custom_call.1
= control target key start
LH: loop header
LB: loop body
LE: loop exit
PB: predicated region body
PF: predicated region fallthrough
CT: control target
= control target key end

     0   :  { %11 = vsyncpa [#allocation3], 0  ;;  %vm83_vm0 = vcmask 1040384   ;;  %vm84_vm1 = vcmask 1041408   ;;  %v419_v2 = vmov 65535   ;;  %vm58_vm2 = vcmask 23552   ;;  %s557_s0 = inlined_call_operand.vmem [shape: f32[16,8,3], index: 0, kind: input, shape index: {}]   ;;  %s558_s1 = inlined_call_operand.vmem [shape: bf16[3,128], index: 1, kind: input, shape index: {}]   ;;  %s559_s2 = inlined_call_operand.vmem [shape: f32[1,128], index: 2, kind: input, shape index: {}]   ;;  %s560_s3 = inlined_call_operand.hbm [shape: f32[16,8,128], index: 3, kind: output, shape index: {0}]   ;;  %s561_s4 = inlined_call_operand.hbm [shape: f32[1,128], index: 4, kind: output, shape index: {1}]   ;;  %s562_s5 = inlined_call_operand.hbm [shape: f32[1,128], index: 5, kind: output, shape index: {2}]  }
   0x1   :  { %v42_v0 = vld [vmem:[%s558_s1] sm:$0x3]  ;;  %v85_v3 = vsel %vm83_vm0, 4294967295, %v419_v2  ;;  %v27_v4 = vld [vmem:[%s557_s0 + $0x8] sm:$0xff]  ;;  %v28_v7 = vld [vmem:[%s557_s0 + $0x10] sm:$0xff] }
   0x2   :  { %v26_v1 = vld [vmem:[%s557_s0] sm:$0xff]  ;;  %v86_v5 = vsel %vm84_vm1, %v85_v3, 0  ;;  %v29_v8 = vld [vmem:[%s557_s0 + $0x18] sm:$0xff]  ;;  %v31_v11 = vld [vmem:[%s557_s0 + $0x28] sm:$0xff] }
   0x3   :  { %v43_v6 = vpack.c.bf16 %v27_v4, %v26_v1  ;;  %v30_v9 = vld [vmem:[%s557_s0 + $0x20] sm:$0xff]  ;;  %v88_v10 = vand.u32 %v86_v5, %v42_v0  ;;  %v35_v13 = vld [vmem:[%s557_s0 + $0x48] sm:$0xff]  ;;  %v36_v15 = vld [vmem:[%s557_s0 + $0x50] sm:$0xff]  ;;  %v44_v18 = vpack.c.bf16 %v29_v8, %v28_v7 }
   0x4   :  { %v34_v12 = vld [vmem:[%s557_s0 + $0x40] sm:$0xff]  ;;  %v37_v16 = vld [vmem:[%s557_s0 + $0x58] sm:$0xff]  ;;  %v39_v20 = vld [vmem:[%s557_s0 + $0x68] sm:$0xff]  ;;  %v45_v21 = vpack.c.bf16 %v31_v11, %v30_v9 }
   0x5   :  { %330 = vmatprep.mubr.msk.bf16.mxu0 %vm58_vm2, %v43_v6  ;;  %v47_v14 = vpack.c.bf16 %v35_v13, %v34_v12  ;;  %v38_v17 = vld [vmem:[%s557_s0 + $0x60] sm:$0xff]  ;;  %328 = vmatprep.subr.bf16.mxu0 %v88_v10  ;;  %v48_v19 = vpack.c.bf16 %v37_v16, %v36_v15 }
   0x6   :  { %346 = vmatprep.subr.bf16.mxu1 %v88_v10  ;;  %329 = vmatpush3.bf16.msra.mxu0 %v88_v10  ;;  %v49_v22 = vpack.c.bf16 %v39_v20, %v38_v17 }
   0x7   :  { %347 = vmatpush3.bf16.msra.mxu1 %v88_v10 }
   0x8   :  { %12 = vsyncpa [#allocation5], 0  ;;  %338 = vmatprep.mubr.msk.bf16.mxu1 %vm58_vm2, %v47_v14  ;;  %v32_v23 = vld [vmem:[%s557_s0 + $0x30] sm:$0xff]  ;;  %v33_v24 = vld [vmem:[%s557_s0 + $0x38] sm:$0xff]  ;;  %v420_v29 = vmov 0.0  }
   0x9   :  { %331 = vmatmul.mubr.msk.bf16.vlgmr.msra.gmra.mxu0 %vm58_vm2, %v44_v18  ;;  %v40_v25 = vld [vmem:[%s557_s0 + $0x70] sm:$0xff]  ;;  %v41_v26 = vld [vmem:[%s557_s0 + $0x78] sm:$0xff]  ;;  %v46_v27 = vpack.c.bf16 %v33_v24, %v32_v23  ;;  %24 = vst [vmem:[#allocation4] sm:$0x1] %v420_v29  ;;  %25 = vst [vmem:[#allocation6] sm:$0x1] %v420_v29 }
   0xa   :  { %339 = vmatmul.mubr.msk.bf16.vlgmr.msra.gmra.mxu1 %vm58_vm2, %v48_v19  ;;  %334 = vmatprep.mubr.msk.bf16.mxu0 %vm58_vm2, %v45_v21  ;;  %v50_v28 = vpack.c.bf16 %v41_v26, %v40_v25  ;;  %v310_v30 = vld [vmem:[%s559_s2] ss:$0 sm:$0xff]  ;;  %s421_s0 = smov [#allocation2]  }
   0xb   :  { %342 = vmatprep.mubr.msk.bf16.mxu1 %vm58_vm2, %v49_v22  ;;  %s272_s2 = sshll.u32 %s421_s0, 4  ;;  %s273_s2 = int_to_ptr.vmem [resolvable:$true] %s272_s2 }
   0xc   :  { %s355_s27 = scalar_lea.vmem %s273_s2, 2048  ;;  %p360_p1 = scmp.lt.s32.totalorder %s273_s2, %s273_s2 }
   0xd   :  { %p356_p0 = scmp.ne.s32.totalorder %s273_s2, %s355_s27  ;;  %p361_p2 = scmp.lt.s32.totalorder %s355_s27, %s355_s27 }
   0xf   :  { %p362_p3 = por %p361_p2, %p360_p1 }
  0x11   :  { %335 = vmatmul.mubr.msk.bf16.gmra.mxu0 %vm58_vm2, %v46_v27  ;;  %p363_p4 = pnand %p362_p3, %p356_p0 }
  0x12   :  { %343 = vmatmul.mubr.msk.bf16.gmra.mxu1 %vm58_vm2, %v50_v28 }
  0xc9   :  { %v332_v31 = vpop.f32.mrf.mxu0 }
  0xca   :  { %v340_v32 = vpop.f32.mrf.mxu1  ;;  %v133_v33 = vadd.f32 %v332_v31, %v310_v30 }
  0xcb   :  { %v518_v34 = vadd.f32 %v340_v32, %v310_v30  ;;  %v124_v35 = vpop.f32.mrf.mxu0 }
  0xcc   :  { %v156_v36 = vpop.f32.mrf.mxu1  ;;  %189 = vst [vmem:[#allocation2 + $0x10] sm:$0xff] %v133_v33  ;;  %v125_v37 = vadd.f32 %v310_v30, %v124_v35  ;;  %v230_v56 = vmul.f32 %v133_v33, %v133_v33 }
  0xcd   :  { %197 = vst [vmem:[#allocation2 + $0x50] sm:$0xff] %v518_v34  ;;  %v521_v38 = vadd.f32 %v310_v30, %v156_v36  ;;  %v333_v39 = vpop.f32.mrf.mxu0 }
  0xce   :  { %v341_v40 = vpop.f32.mrf.mxu1  ;;  %187 = vst [vmem:[#allocation2] sm:$0xff] %v125_v37  ;;  %v136_v41 = vadd.f32 %v333_v39, %v310_v30  ;;  %v228_v49 = vmul.f32 %v125_v37, %v125_v37 }
  0xcf   :  { %195 = vst [vmem:[#allocation2 + $0x40] sm:$0xff] %v521_v38  ;;  %v524_v42 = vadd.f32 %v341_v40, %v310_v30  ;;  %v127_v43 = vpop.f32.mrf.mxu0 }
  0xd0   :  { %v159_v44 = vpop.f32.mrf.mxu1  ;;  %190 = vst [vmem:[#allocation2 + $0x18] sm:$0xff] %v136_v41  ;;  %v128_v45 = vadd.f32 %v310_v30, %v127_v43  ;;  %v231_v63 = vmul.f32 %v136_v41, %v136_v41 }
  0xd1   :  { %198 = vst [vmem:[#allocation2 + $0x58] sm:$0xff] %v524_v42  ;;  %v527_v46 = vadd.f32 %v310_v30, %v159_v44  ;;  %v336_v47 = vpop.f32.mrf.mxu0 }
  0xd2   :  { %v344_v48 = vpop.f32.mrf.mxu1  ;;  %188 = vst [vmem:[#allocation2 + $0x8] sm:$0xff] %v128_v45  ;;  %v204_v50 = vadd.f32 %v128_v45, %v125_v37  ;;  %v229_v51 = vmul.f32 %v128_v45, %v128_v45  ;;  %v149_v52 = vadd.f32 %v336_v47, %v310_v30 }
  0xd3   :  { %196 = vst [vmem:[#allocation2 + $0x48] sm:$0xff] %v527_v46  ;;  %v140_v53 = vpop.f32.mrf.mxu0  ;;  %v530_v54 = vadd.f32 %v344_v48, %v310_v30 }
  0xd4   :  { %v172_v55 = vpop.f32.mrf.mxu1  ;;  %v205_v57 = vadd.f32 %v204_v50, %v133_v33  ;;  %v244_v58 = vadd.f32 %v229_v51, %v228_v49  ;;  %193 = vst [vmem:[#allocation2 + $0x30] sm:$0xff] %v149_v52  ;;  %v141_v59 = vadd.f32 %v310_v30, %v140_v53  ;;  %v234_v14 = vmul.f32 %v149_v52, %v149_v52 }
  0xd5   :  { %v337_v60 = vpop.f32.mrf.mxu0  ;;  %201 = vst [vmem:[#allocation2 + $0x70] sm:$0xff] %v530_v54  ;;  %v173_v61 = vadd.f32 %v310_v30, %v172_v55 }
  0xd6   :  { %v345_v62 = vpop.f32.mrf.mxu1  ;;  %v245_v0 = vadd.f32 %v244_v58, %v230_v56  ;;  %191 = vst [vmem:[#allocation2 + $0x20] sm:$0xff] %v141_v59  ;;  %v206_v1 = vadd.f32 %v205_v57, %v136_v41  ;;  %v152_v2 = vadd.f32 %v337_v60, %v310_v30  ;;  %v232_v7 = vmul.f32 %v141_v59, %v141_v59 }
  0xd7   :  { %v143_v3 = vpop.f32.mrf.mxu0  ;;  %199 = vst [vmem:[#allocation2 + $0x60] sm:$0xff] %v173_v61  ;;  %v184_v4 = vadd.f32 %v345_v62, %v310_v30 }
  0xd8   :  { %v175_v5 = vpop.f32.mrf.mxu1  ;;  %v207_v6 = vadd.f32 %v206_v1, %v141_v59  ;;  %v246_v8 = vadd.f32 %v245_v0, %v231_v63  ;;  %194 = vst [vmem:[#allocation2 + $0x38] sm:$0xff] %v152_v2  ;;  %v144_v9 = vadd.f32 %v310_v30, %v143_v3 }
  0xd9   :  { %202 = vst [vmem:[#allocation2 + $0x78] sm:$0xff] %v184_v4  ;;  %v176_v10 = vadd.f32 %v310_v30, %v175_v5 }
  0xda   :  { %v247_v11 = vadd.f32 %v246_v8, %v232_v7  ;;  %192 = vst [vmem:[#allocation2 + $0x28] sm:$0xff] %v144_v9  ;;  %v208_v12 = vadd.f32 %v207_v6, %v144_v9  ;;  %v233_v13 = vmul.f32 %v144_v9, %v144_v9 }
  0xdb   :  { %200 = vst [vmem:[#allocation2 + $0x68] sm:$0xff] %v176_v10 }
  0xdc   :  { %v209_v15 = vadd.f32 %v208_v12, %v149_v52  ;;  %v248_v16 = vadd.f32 %v247_v11, %v233_v13 }
  0xdd   :  { %366 = shalt.err (!%p363_p4)
}
  0xde   :  { %s422_s28 = smov 128   ;;  %s423_s29 = smov 8   ;;  %v235_v17 = vmul.f32 %v152_v2, %v152_v2  ;;  %v249_v18 = vadd.f32 %v248_v16, %v234_v14  ;;  %v210_v19 = vadd.f32 %v209_v15, %v152_v2  ;;  %v236_v20 = vmul.f32 %v521_v38, %v521_v38  ;;  %v203_v55 = vld [vmem:[#allocation4] sm:$0x1] }
  0xdf   :  { %278 = dma.vmem_to_hbm [thread:$0]  %s273_s2, 2048, %s560_s3, [#allocation3], %s422_s28, %s422_s28, %s423_s29   ;;  %v237_v24 = vmul.f32 %v527_v46, %v527_v46  ;;  %v238_v26 = vmul.f32 %v518_v34, %v518_v34  ;;  %v239_v29 = vmul.f32 %v524_v42, %v524_v42  ;;  %v240_v33 = vmul.f32 %v173_v61, %v173_v61 }
  0xe0   :  { %v211_v21 = vadd.f32 %v210_v19, %v521_v38  ;;  %v250_v22 = vadd.f32 %v249_v18, %v235_v17  ;;  %v241_v38 = vmul.f32 %v176_v10, %v176_v10  ;;  %v242_v39 = vmul.f32 %v530_v54, %v530_v54  ;;  %s424_s3 = smov [#allocation4]   ;;  %s425_s8 = smov [#allocation6]  }
  0xe1   :  { %s285_s7 = sshll.u32 %s424_s3, 4  ;;  %s295_s9 = sshll.u32 %s425_s8, 4  ;;  %s286_s7 = int_to_ptr.vmem [resolvable:$true] %s285_s7  ;;  %s296_s9 = int_to_ptr.vmem [resolvable:$true] %s295_s9 }
  0xe2   :  { %v212_v23 = vadd.f32 %v211_v21, %v527_v46  ;;  %v251_v25 = vadd.f32 %v250_v22, %v236_v20  ;;  %s375_s10 = scalar_lea.vmem %s286_s7, 16  ;;  %s379_s11 = scalar_lea.vmem %s286_s7, 32 }
  0xe3   :  { %p376_p5 = scmp.ne.s32.totalorder %s286_s7, %s375_s10  ;;  %p380_p6 = scmp.lt.s32.totalorder %s286_s7, %s286_s7 }
  0xe4   :  { %v213_v27 = vadd.f32 %v212_v23, %v518_v34  ;;  %v252_v28 = vadd.f32 %v251_v25, %v237_v24  ;;  %v243_v34 = vmul.f32 %v184_v4, %v184_v4  ;;  %p381_p7 = scmp.lt.s32.totalorder %s379_s11, %s375_s10 }
  0xe6   :  { %v253_v30 = vadd.f32 %v252_v28, %v238_v26  ;;  %v214_v31 = vadd.f32 %v213_v27, %v524_v42  ;;  %p382_p8 = por %p381_p7, %p380_p6 }
  0xe8   :  { %v215_v32 = vadd.f32 %v214_v31, %v173_v61  ;;  %v254_v35 = vadd.f32 %v253_v30, %v239_v29  ;;  %p383_p9 = pnand %p382_p8, %p376_p5 }
  0xea   :  { %v255_v36 = vadd.f32 %v254_v35, %v240_v33  ;;  %v216_v37 = vadd.f32 %v215_v32, %v176_v10 }
  0xec   :  { %v217_v40 = vadd.f32 %v216_v37, %v530_v54  ;;  %v256_v41 = vadd.f32 %v255_v36, %v241_v38  ;;  %v227_v54 = vld [vmem:[#allocation6] sm:$0x1] }
  0xee   :  { %v218_v43 = vadd.f32 %v217_v40, %v184_v4  ;;  %v257_v44 = vadd.f32 %v256_v41, %v242_v39 }
  0xf0   :  { %v219_v45 = vrot.slane %v218_v43, 4  ;;  %v258_v46 = vadd.f32 %v257_v44, %v243_v34 }
  0xf2   :  { %v220_v47 = vadd.f32 %v219_v45, %v218_v43  ;;  %v259_v48 = vrot.slane %v258_v46, 4 }
  0xf4   :  { %v221_v42 = vrot.slane %v220_v47, 2  ;;  %v260_v49 = vadd.f32 %v259_v48, %v258_v46 }
  0xf6   :  { %v222_v50 = vadd.f32 %v221_v42, %v220_v47  ;;  %v261_v51 = vrot.slane %v260_v49, 2 }
  0xf8   :  { %v223_v52 = vrot.slane %v222_v50, 1  ;;  %v262_v53 = vadd.f32 %v261_v51, %v260_v49 }
  0xfa   :  { %v224_v56 = vadd.f32 %v223_v52, %v222_v50  ;;  %v263_v57 = vrot.slane %v262_v53, 1 }
  0xfc   :  { %v225_v58 = vadd.f32 %v224_v56, %v203_v55  ;;  %v264_v59 = vadd.f32 %v263_v57, %v262_v53 }
  0xfe   :  { %226 = vst [vmem:[#allocation4] sm:$0x1] %v225_v58  ;;  %v265_v60 = vadd.f32 %v264_v59, %v227_v54 }
  0xff   :  { %386 = shalt.err (!%p383_p9)
}
 0x100   :  { %288 = dma.vmem_to_hbm [thread:$0]  %s286_s7, 16, %s561_s4, [#allocation5]   ;;  %266 = vst [vmem:[#allocation6] sm:$0x1] %v265_v60 }
 0x101   :  { %s395_s14 = scalar_lea.vmem %s296_s9, 16  ;;  %s399_s15 = scalar_lea.vmem %s296_s9, 32 }
 0x102   :  { %p396_p10 = scmp.ne.s32.totalorder %s296_s9, %s395_s14  ;;  %p400_p11 = scmp.lt.s32.totalorder %s296_s9, %s296_s9 }
 0x103   :  { %p401_p12 = scmp.lt.s32.totalorder %s399_s15, %s395_s14 }
 0x105   :  { %p402_p13 = por %p401_p12, %p400_p11 }
 0x107   :  { %p403_p0 = pnand %p402_p13, %p396_p10 }
 0x109   :  { %406 = shalt.err (!%p403_p0)
}
 0x10a   :  { %298 = dma.vmem_to_hbm [thread:$0]  %s296_s9, 16, %s562_s5, [#allocation5]  }
 0x10b   :  { %415 = dma.done.wait [#allocation3], 2048  }
 0x10c   :  { %416 = vsyncadd [#allocation3], 4294965248 }
 0x10d   :  { %417 = dma.done.wait [#allocation5], 32  }
 0x10e   :  { %418 = vsyncadd [#allocation5], 4294967264 }
 0x10f   :  { %308 = vsyncpa [#allocation3], 1 }
 0x110   :  { %309 = vsyncpa [#allocation5], 1 }

</bundles_post_ra>
